<compile_context>
chip_gen: v6e
topology: v6e:2x2x1
jax: 0.10.0
libtpu: 0.0.40
codegen_flags: <defaults>
</compile_context>

<pallas_src>
import functools

import jax
import jax.numpy as jnp
import numpy as np
from jax import lax
from jax.experimental import pallas as pl
from jax.experimental.pallas import tpu as pltpu


def _ltm_kernel(q_ref, kt_ref, v_ref, out_ref, *, k_top):
    # q_ref : [TB, Dk] f32      kt_ref : [Dk, L] f32 (keys pre-transposed)
    # v_ref : [L, Dv] f32|bf16  out_ref: [TB, SLAB_W] f32 (packed, lane-dense)
    q = q_ref[...]
    kt = kt_ref[...]

    # lookup_weights = queries @ keys.T; keys stored transposed so the MXU gets
    # a lane-dense [Dk, L] RHS and no in-kernel XLU transpose is needed.
    scores = jnp.dot(q, kt, preferred_element_type=jnp.float32)      # [TB, L]

    tb, L = scores.shape
    dv = v_ref.shape[-1]
    slab_w = out_ref.shape[-1]

    lane_idx = lax.broadcasted_iota(jnp.int32, (tb, L), 1)
    rev_idx = L - lane_idx                       # hoisted out of the K loop
    col_idx = lax.broadcasted_iota(jnp.int32, (tb, k_top), 1)
    neg_big = jnp.float32(-1e30)

    # Iterative top-k (K static & small -> unrolled).  Per iteration: two XLU
    # cross-lane reduces (max value, first-occurrence index) + VPU selects.
    # Softmax numerators are scattered over L as we go, so no [TB, L]-wide exp
    # is ever taken, and the per-k results land in fixed [TB, K] buffers.
    work = scores
    e_buf = jnp.zeros((tb, k_top), jnp.float32)     # exp(top_v_k - top_v_0)
    i_buf = jnp.zeros((tb, k_top), jnp.int32)       # top-k indices
    e_scat = jnp.zeros((tb, L), jnp.float32)        # numerators scattered on L
    z = jnp.zeros((tb, 1), jnp.float32)             # softmax denominator
    m0 = None
    for j in range(k_top):
        m = jnp.max(work, axis=-1, keepdims=True)                     # [TB, 1]
        is_max = work == m
        # first occurrence of the max (stable; matches torch.topk / lax.top_k)
        idx = L - jnp.max(jnp.where(is_max, rev_idx, 0),
                          axis=-1, keepdims=True)                     # [TB, 1]
        hit = lane_idx == idx                                         # one-hot
        work = jnp.where(hit, neg_big, work)
        if j == 0:
            m0 = m                                                    # row max
            e = jnp.ones((tb, 1), jnp.float32)       # exp(m - m0) == 1 exactly
        else:
            e = jnp.exp(m - m0)                                       # [TB, 1]
        z = z + e
        e_scat = e_scat + jnp.where(hit, e, 0.0)
        sel = col_idx == j
        e_buf = jnp.where(sel, e, e_buf)
        i_buf = jnp.where(sel, idx, i_buf)

    # 1/z via the EUP approx reciprocal + one Newton step (~f32 accuracy for
    # z in [1, K]); keeps the divide off the VPU critical path.
    r = pl.reciprocal(z, approx=True)
    inv_z = r * (2.0 - z * r)

    weights = e_buf * inv_z                                           # [TB, K]

    # Weighted gather of values as (scattered numerators) @ values, scaled by
    # 1/z afterwards (Dv <= L, so scale the smaller tensor).  Cast to the
    # values dtype so the bf16 path feeds the MXU bf16 on both sides.
    vals = v_ref[...]
    weighted = jnp.dot(e_scat.astype(vals.dtype), vals,
                       preferred_element_type=jnp.float32) * inv_z    # [TB,Dv]

    # Pack into one lane-dense f32 slab with direct static sub-slice stores:
    #   [ weighted (Dv) | weights (K) | indices-as-f32 (K) | zero pad ]
    out_ref[:, :dv] = weighted
    out_ref[:, dv:dv + k_top] = weights
    out_ref[:, dv + k_top:dv + 2 * k_top] = i_buf.astype(jnp.float32)
    if slab_w > dv + 2 * k_top:
        out_ref[:, dv + 2 * k_top:slab_w] = jnp.zeros(
            (tb, slab_w - (dv + 2 * k_top)), jnp.float32)


def freq_pruning_ltm_forward(queries, keys_t, values, query_breadth, *,
                             batch_blocks=None, values_in_bf16=True,
                             use_core_parallel=False):
    """Pallas implementation of FreqPruningLTM.forward.

    queries : [B, Dk] f32
    keys_t  : [Dk, L] f32 — the keys parameter stored TRANSPOSED (one-time at
              parameter init, so no per-call XLA transpose).
    values  : [L, Dv] — cast to bf16 by default (values_in_bf16=True); the
              scores/top-k path stays f32 so selection semantics are exact.
    batch_blocks : None = auto (1 step for small B, ~256-row tiles for large B
              so the queries/output DMAs pipeline with compute).
    use_core_parallel : v7x only — mark the batch grid axis CORE_PARALLEL to
              shard it across the two TensorCores.  Only worthwhile when each
              core gets >= ~128 rows; leave False otherwise.
    """
    B, Dk = queries.shape
    Dk2, L = keys_t.shape
    L2, Dv = values.shape
    assert Dk == Dk2 and L == L2
    K = query_breadth
    assert L < (1 << 24)            # indices ride through the f32 output slab

    if batch_blocks is None:
        batch_blocks = 1
        if B >= 512:
            # aim for ~256-row tiles; keep divisibility + (8,·) block rule
            batch_blocks = max(1, B // 256)
            while batch_blocks > 1 and (B % batch_blocks != 0 or
                                        (B // batch_blocks) % 8 != 0):
                batch_blocks -= 1
    assert batch_blocks >= 1 and B % batch_blocks == 0
    batch_tile = B // batch_blocks
    assert batch_blocks == 1 or batch_tile % 8 == 0

    if values_in_bf16 and values.dtype != jnp.bfloat16:
        values = values.astype(jnp.bfloat16)

    slab_w = ((Dv + 2 * K + 127) // 128) * 128
    kernel = functools.partial(_ltm_kernel, k_top=K)

    # VMEM footprint estimate (sublane/lane padded, double-buffered) -> set the
    # scoped VMEM limit explicitly with headroom.
    def _padded_bytes(rows, cols, itemsize):
        return (-(-rows // 8) * 8) * (-(-cols // 128) * 128) * itemsize

    v_item = 2 if values.dtype == jnp.bfloat16 else 4
    est = 2 * (_padded_bytes(batch_tile, Dk, 4) +
               _padded_bytes(Dk, L, 4) +
               _padded_bytes(L, Dv, v_item) +
               _padded_bytes(batch_tile, slab_w, 4))
    # TODO(synk): once kt+values residency approaches ~24-32 MiB (v7x has only
    # 64 MiB physical VMEM), add an 'arbitrary' L grid axis with a streaming
    # top-k / running softmax instead of keeping full-L keys/values resident.
    assert est <= (40 << 20), "full-L residency too large for VMEM; stream L"
    vmem_limit = int(min(48 << 20, max(16 << 20, est + (2 << 20))))

    if batch_blocks > 1 and use_core_parallel:
        semantics = (pltpu.CORE_PARALLEL,)      # v7x: shard batch over 2 TCs
    else:
        semantics = ("parallel",)

    slab = pl.pallas_call(
        kernel,
        out_shape=jax.ShapeDtypeStruct((B, slab_w), jnp.float32),
        grid_spec=pltpu.PrefetchScalarGridSpec(
            num_scalar_prefetch=0,
            grid=(batch_blocks,),
            in_specs=[
                pl.BlockSpec((batch_tile, Dk), lambda i: (i, 0)),
                # keys / values map to the same block every step -> kept
                # resident by the pipeline, no redundant DMAs.
                pl.BlockSpec((Dk, L), lambda i: (0, 0)),
                pl.BlockSpec((L, Dv), lambda i: (0, 0)),
            ],
            out_specs=pl.BlockSpec((batch_tile, slab_w), lambda i: (i, 0)),
        ),
        compiler_params=pltpu.CompilerParams(
            dimension_semantics=semantics,
            vmem_limit_bytes=vmem_limit,
        ),
    )(queries, keys_t, values)

    weighted = slab[:, :Dv]
    weights = slab[:, Dv:Dv + K]
    inds = slab[:, Dv + K:Dv + 2 * K].astype(jnp.int32)
    return weighted, inds, weights


def _reference(queries, keys, values, K):
    # Pure-JAX reference of the PyTorch forward.
    scores = queries @ keys.T
    top_vals, top_inds = lax.top_k(scores, K)
    w = jax.nn.softmax(top_vals, axis=1)
    sel = jnp.take(values, top_inds, axis=0)            # [B, K, Dv]
    out = jnp.sum(sel * w[..., None], axis=1)
    return out, top_inds, w


if __name__ == "__main__":
    # Small, TPU-friendly sizes consistent with the module:
    #   nb_key_chan=16, nb_v_chan=32, query_breadth=8, max_len=128, batch=16
    B, Dk, Dv, L, K = 16, 16, 32, 128, 8

    key = jax.random.PRNGKey(0)
    k1, k2, k3 = jax.random.split(key, 3)
    keys_param = jax.random.normal(k1, (L, Dk), dtype=jnp.float32)    # self.keys
    values_param = jax.random.normal(k2, (L, Dv), dtype=jnp.float32)  # self.values
    queries = jax.random.normal(k3, (B, Dk), dtype=jnp.float32)

    # One-time "parameter init" transpose: store keys as [Dk, L] so the forward
    # never pays a per-call XLA transpose.
    keys_t_param = jnp.asarray(keys_param.T)

    ref_out, ref_inds, ref_w = _reference(queries, keys_param, values_param, K)

    # f32-values path: exact module semantics.
    out, inds, weights = freq_pruning_ltm_forward(
        queries, keys_t_param, values_param, K, values_in_bf16=False)
    jax.block_until_ready((out, inds, weights))
    assert np.allclose(np.asarray(out), np.asarray(ref_out), atol=1e-4, rtol=1e-4)
    assert np.array_equal(np.asarray(inds), np.asarray(ref_inds))
    assert np.allclose(np.asarray(weights), np.asarray(ref_w), atol=1e-5, rtol=1e-5)

    # Default (bf16 values) path: selection (indices / weights) unchanged,
    # weighted output within bf16 tolerance.
    out_bf, inds_bf, w_bf = freq_pruning_ltm_forward(
        queries, keys_t_param, values_param, K)
    jax.block_until_ready((out_bf, inds_bf, w_bf))
    assert np.array_equal(np.asarray(inds_bf), np.asarray(ref_inds))
    assert np.allclose(np.asarray(w_bf), np.asarray(ref_w), atol=1e-5, rtol=1e-5)
    assert np.allclose(np.asarray(out_bf), np.asarray(ref_out), atol=5e-2, rtol=5e-2)

    # Multi-step batch grid (auto tiling at large B): tile the same 16 rows
    # 64x -> B=1024 picks a 4-step grid with 256-row tiles; results must match
    # the single-step run row-for-row.
    reps = 64
    queries_big = jnp.tile(queries, (reps, 1))
    out_big, inds_big, w_big = freq_pruning_ltm_forward(
        queries_big, keys_t_param, values_param, K)
    jax.block_until_ready((out_big, inds_big, w_big))
    assert np.allclose(np.asarray(out_big),
                       np.tile(np.asarray(out_bf), (reps, 1)),
                       atol=1e-6, rtol=1e-6)
    assert np.array_equal(np.asarray(inds_big),
                          np.tile(np.asarray(inds_bf), (reps, 1)))
    assert np.allclose(np.asarray(w_big),
                       np.tile(np.asarray(w_bf), (reps, 1)),
                       atol=1e-6, rtol=1e-6)

    print("KERNEL_OK")
</pallas_src>

<mosaic_0001>
module attributes {stable_mosaic.version = 11 : i64} {
  func.func @_ltm_kernel(%arg0: i32, %arg1: memref<16x16xf32, #tpu.memory_space<vmem>>, %arg2: memref<16x128xf32, #tpu.memory_space<vmem>>, %arg3: memref<128x32xf32, #tpu.memory_space<vmem>>, %arg4: memref<16x128xf32, #tpu.memory_space<vmem>>) attributes {dimension_semantics = [#tpu.dimension_semantics<parallel>], iteration_bounds = array<i64: 1>, scalar_prefetch = 0 : i64, scratch_operands = 0 : i64, tpu.core_type = #tpu.core_type<tc>, window_params = [{transform_indices = @transform_0, window_bounds = array<i64: 16, 16>}, {pipeline_mode = #tpu.pipeline_mode<synchronous>, transform_indices = @transform_1, window_bounds = array<i64: 16, 128>}, {pipeline_mode = #tpu.pipeline_mode<synchronous>, transform_indices = @transform_2, window_bounds = array<i64: 128, 32>}, {transform_indices = @transform_3, window_bounds = array<i64: 16, 128>}]} {
    %c0 = arith.constant 0 : index
    %c0_0 = arith.constant 0 : index
    %0 = vector.load %arg1[%c0, %c0_0] : memref<16x16xf32, #tpu.memory_space<vmem>>, vector<16x16xf32>
    %c0_1 = arith.constant 0 : index
    %c0_2 = arith.constant 0 : index
    %1 = vector.load %arg2[%c0_1, %c0_2] : memref<16x128xf32, #tpu.memory_space<vmem>>, vector<16x128xf32>
    %cst = arith.constant dense<0.000000e+00> : vector<16x128xf32>
    %2 = tpu.matmul %0, %1, %cst {dimension_numbers = #tpu.dot_dimension_numbers<[1], [0], [0], [1], [0, 0, 1, 1], [], []>} : vector<16x16xf32>, vector<16x128xf32>, vector<16x128xf32> -> vector<16x128xf32>
    %3 = tpu.iota {dimensions = array<i32: 1>} : vector<16x128xi32>
    %c128_i32 = arith.constant 128 : i32
    %4 = vector.broadcast %c128_i32 : i32 to vector<16x128xi32>
    %5 = arith.subi %4, %3 : vector<16x128xi32>
    %6 = tpu.iota {dimensions = array<i32: 1>} : vector<16x8xi32>
    %cst_3 = arith.constant 0.000000e+00 : f32
    %7 = vector.broadcast %cst_3 : f32 to vector<16x8xf32>
    %c0_i32 = arith.constant 0 : i32
    %8 = vector.broadcast %c0_i32 : i32 to vector<16x8xi32>
    %cst_4 = arith.constant 0.000000e+00 : f32
    %9 = vector.broadcast %cst_4 : f32 to vector<16x128xf32>
    %cst_5 = arith.constant 0.000000e+00 : f32
    %10 = vector.broadcast %cst_5 : f32 to vector<16x1xf32>
    %cst_6 = arith.constant dense<0xFF800000> : vector<16xf32>
    %11 = vector.multi_reduction <maximumf>, %2, %cst_6 [1] : vector<16x128xf32> to vector<16xf32>
    %12 = vector.shape_cast %11 : vector<16xf32> to vector<16x1xf32>
    %13 = vector.broadcast %12 : vector<16x1xf32> to vector<16x128xf32>
    %14 = arith.cmpf oeq, %2, %13 : vector<16x128xf32>
    %c0_i32_7 = arith.constant 0 : i32
    %15 = vector.broadcast %c0_i32_7 : i32 to vector<16x128xi32>
    %16 = arith.select %14, %5, %15 : vector<16x128xi1>, vector<16x128xi32>
    %cst_8 = arith.constant dense<-2147483648> : vector<16xi32>
    %17 = vector.multi_reduction <maxsi>, %16, %cst_8 [1] : vector<16x128xi32> to vector<16xi32>
    %18 = vector.shape_cast %17 : vector<16xi32> to vector<16x1xi32>
    %c128_i32_9 = arith.constant 128 : i32
    %19 = vector.broadcast %c128_i32_9 : i32 to vector<16x1xi32>
    %20 = arith.subi %19, %18 : vector<16x1xi32>
    %21 = vector.broadcast %20 : vector<16x1xi32> to vector<16x128xi32>
    %22 = arith.cmpi eq, %3, %21 : vector<16x128xi32>
    %cst_10 = arith.constant -1.000000e+30 : f32
    %23 = vector.broadcast %cst_10 : f32 to vector<16x128xf32>
    %24 = arith.select %22, %23, %2 : vector<16x128xi1>, vector<16x128xf32>
    %cst_11 = arith.constant 1.000000e+00 : f32
    %25 = vector.broadcast %cst_11 : f32 to vector<16x1xf32>
    %26 = arith.addf %10, %25 : vector<16x1xf32>
    %cst_12 = arith.constant 0.000000e+00 : f32
    %27 = vector.shape_cast %25 : vector<16x1xf32> to vector<16x1xf32>
    %28 = vector.broadcast %27 : vector<16x1xf32> to vector<16x128xf32>
    %29 = vector.broadcast %cst_12 : f32 to vector<16x128xf32>
    %30 = arith.select %22, %28, %29 : vector<16x128xi1>, vector<16x128xf32>
    %31 = arith.addf %9, %30 : vector<16x128xf32>
    %c0_i32_13 = arith.constant 0 : i32
    %32 = vector.broadcast %c0_i32_13 : i32 to vector<16x8xi32>
    %33 = arith.cmpi eq, %6, %32 : vector<16x8xi32>
    %34 = vector.shape_cast %25 : vector<16x1xf32> to vector<16x1xf32>
    %35 = vector.broadcast %34 : vector<16x1xf32> to vector<16x8xf32>
    %36 = arith.select %33, %35, %7 : vector<16x8xi1>, vector<16x8xf32>
    %37 = vector.shape_cast %20 : vector<16x1xi32> to vector<16x1xi32>
    %38 = vector.broadcast %37 : vector<16x1xi32> to vector<16x8xi32>
    %39 = arith.select %33, %38, %8 : vector<16x8xi1>, vector<16x8xi32>
    %cst_14 = arith.constant dense<0xFF800000> : vector<16xf32>
    %40 = vector.multi_reduction <maximumf>, %24, %cst_14 [1] : vector<16x128xf32> to vector<16xf32>
    %41 = vector.shape_cast %40 : vector<16xf32> to vector<16x1xf32>
    %42 = vector.broadcast %41 : vector<16x1xf32> to vector<16x128xf32>
    %43 = arith.cmpf oeq, %24, %42 : vector<16x128xf32>
    %c0_i32_15 = arith.constant 0 : i32
    %44 = vector.broadcast %c0_i32_15 : i32 to vector<16x128xi32>
    %45 = arith.select %43, %5, %44 : vector<16x128xi1>, vector<16x128xi32>
    %cst_16 = arith.constant dense<-2147483648> : vector<16xi32>
    %46 = vector.multi_reduction <maxsi>, %45, %cst_16 [1] : vector<16x128xi32> to vector<16xi32>
    %47 = vector.shape_cast %46 : vector<16xi32> to vector<16x1xi32>
    %c128_i32_17 = arith.constant 128 : i32
    %48 = vector.broadcast %c128_i32_17 : i32 to vector<16x1xi32>
    %49 = arith.subi %48, %47 : vector<16x1xi32>
    %50 = vector.broadcast %49 : vector<16x1xi32> to vector<16x128xi32>
    %51 = arith.cmpi eq, %3, %50 : vector<16x128xi32>
    %cst_18 = arith.constant -1.000000e+30 : f32
    %52 = vector.broadcast %cst_18 : f32 to vector<16x128xf32>
    %53 = arith.select %51, %52, %24 : vector<16x128xi1>, vector<16x128xf32>
    %54 = arith.subf %41, %12 : vector<16x1xf32>
    %55 = math.exp %54 : vector<16x1xf32>
    %56 = arith.addf %26, %55 : vector<16x1xf32>
    %cst_19 = arith.constant 0.000000e+00 : f32
    %57 = vector.shape_cast %55 : vector<16x1xf32> to vector<16x1xf32>
    %58 = vector.broadcast %57 : vector<16x1xf32> to vector<16x128xf32>
    %59 = vector.broadcast %cst_19 : f32 to vector<16x128xf32>
    %60 = arith.select %51, %58, %59 : vector<16x128xi1>, vector<16x128xf32>
    %61 = arith.addf %31, %60 : vector<16x128xf32>
    %c1_i32 = arith.constant 1 : i32
    %62 = vector.broadcast %c1_i32 : i32 to vector<16x8xi32>
    %63 = arith.cmpi eq, %6, %62 : vector<16x8xi32>
    %64 = vector.shape_cast %55 : vector<16x1xf32> to vector<16x1xf32>
    %65 = vector.broadcast %64 : vector<16x1xf32> to vector<16x8xf32>
    %66 = arith.select %63, %65, %36 : vector<16x8xi1>, vector<16x8xf32>
    %67 = vector.shape_cast %49 : vector<16x1xi32> to vector<16x1xi32>
    %68 = vector.broadcast %67 : vector<16x1xi32> to vector<16x8xi32>
    %69 = arith.select %63, %68, %39 : vector<16x8xi1>, vector<16x8xi32>
    %cst_20 = arith.constant dense<0xFF800000> : vector<16xf32>
    %70 = vector.multi_reduction <maximumf>, %53, %cst_20 [1] : vector<16x128xf32> to vector<16xf32>
    %71 = vector.shape_cast %70 : vector<16xf32> to vector<16x1xf32>
    %72 = vector.broadcast %71 : vector<16x1xf32> to vector<16x128xf32>
    %73 = arith.cmpf oeq, %53, %72 : vector<16x128xf32>
    %c0_i32_21 = arith.constant 0 : i32
    %74 = vector.broadcast %c0_i32_21 : i32 to vector<16x128xi32>
    %75 = arith.select %73, %5, %74 : vector<16x128xi1>, vector<16x128xi32>
    %cst_22 = arith.constant dense<-2147483648> : vector<16xi32>
    %76 = vector.multi_reduction <maxsi>, %75, %cst_22 [1] : vector<16x128xi32> to vector<16xi32>
    %77 = vector.shape_cast %76 : vector<16xi32> to vector<16x1xi32>
    %c128_i32_23 = arith.constant 128 : i32
    %78 = vector.broadcast %c128_i32_23 : i32 to vector<16x1xi32>
    %79 = arith.subi %78, %77 : vector<16x1xi32>
    %80 = vector.broadcast %79 : vector<16x1xi32> to vector<16x128xi32>
    %81 = arith.cmpi eq, %3, %80 : vector<16x128xi32>
    %cst_24 = arith.constant -1.000000e+30 : f32
    %82 = vector.broadcast %cst_24 : f32 to vector<16x128xf32>
    %83 = arith.select %81, %82, %53 : vector<16x128xi1>, vector<16x128xf32>
    %84 = arith.subf %71, %12 : vector<16x1xf32>
    %85 = math.exp %84 : vector<16x1xf32>
    %86 = arith.addf %56, %85 : vector<16x1xf32>
    %cst_25 = arith.constant 0.000000e+00 : f32
    %87 = vector.shape_cast %85 : vector<16x1xf32> to vector<16x1xf32>
    %88 = vector.broadcast %87 : vector<16x1xf32> to vector<16x128xf32>
    %89 = vector.broadcast %cst_25 : f32 to vector<16x128xf32>
    %90 = arith.select %81, %88, %89 : vector<16x128xi1>, vector<16x128xf32>
    %91 = arith.addf %61, %90 : vector<16x128xf32>
    %c2_i32 = arith.constant 2 : i32
    %92 = vector.broadcast %c2_i32 : i32 to vector<16x8xi32>
    %93 = arith.cmpi eq, %6, %92 : vector<16x8xi32>
    %94 = vector.shape_cast %85 : vector<16x1xf32> to vector<16x1xf32>
    %95 = vector.broadcast %94 : vector<16x1xf32> to vector<16x8xf32>
    %96 = arith.select %93, %95, %66 : vector<16x8xi1>, vector<16x8xf32>
    %97 = vector.shape_cast %79 : vector<16x1xi32> to vector<16x1xi32>
    %98 = vector.broadcast %97 : vector<16x1xi32> to vector<16x8xi32>
    %99 = arith.select %93, %98, %69 : vector<16x8xi1>, vector<16x8xi32>
    %cst_26 = arith.constant dense<0xFF800000> : vector<16xf32>
    %100 = vector.multi_reduction <maximumf>, %83, %cst_26 [1] : vector<16x128xf32> to vector<16xf32>
    %101 = vector.shape_cast %100 : vector<16xf32> to vector<16x1xf32>
    %102 = vector.broadcast %101 : vector<16x1xf32> to vector<16x128xf32>
    %103 = arith.cmpf oeq, %83, %102 : vector<16x128xf32>
    %c0_i32_27 = arith.constant 0 : i32
    %104 = vector.broadcast %c0_i32_27 : i32 to vector<16x128xi32>
    %105 = arith.select %103, %5, %104 : vector<16x128xi1>, vector<16x128xi32>
    %cst_28 = arith.constant dense<-2147483648> : vector<16xi32>
    %106 = vector.multi_reduction <maxsi>, %105, %cst_28 [1] : vector<16x128xi32> to vector<16xi32>
    %107 = vector.shape_cast %106 : vector<16xi32> to vector<16x1xi32>
    %c128_i32_29 = arith.constant 128 : i32
    %108 = vector.broadcast %c128_i32_29 : i32 to vector<16x1xi32>
    %109 = arith.subi %108, %107 : vector<16x1xi32>
    %110 = vector.broadcast %109 : vector<16x1xi32> to vector<16x128xi32>
    %111 = arith.cmpi eq, %3, %110 : vector<16x128xi32>
    %cst_30 = arith.constant -1.000000e+30 : f32
    %112 = vector.broadcast %cst_30 : f32 to vector<16x128xf32>
    %113 = arith.select %111, %112, %83 : vector<16x128xi1>, vector<16x128xf32>
    %114 = arith.subf %101, %12 : vector<16x1xf32>
    %115 = math.exp %114 : vector<16x1xf32>
    %116 = arith.addf %86, %115 : vector<16x1xf32>
    %cst_31 = arith.constant 0.000000e+00 : f32
    %117 = vector.shape_cast %115 : vector<16x1xf32> to vector<16x1xf32>
    %118 = vector.broadcast %117 : vector<16x1xf32> to vector<16x128xf32>
    %119 = vector.broadcast %cst_31 : f32 to vector<16x128xf32>
    %120 = arith.select %111, %118, %119 : vector<16x128xi1>, vector<16x128xf32>
    %121 = arith.addf %91, %120 : vector<16x128xf32>
    %c3_i32 = arith.constant 3 : i32
    %122 = vector.broadcast %c3_i32 : i32 to vector<16x8xi32>
    %123 = arith.cmpi eq, %6, %122 : vector<16x8xi32>
    %124 = vector.shape_cast %115 : vector<16x1xf32> to vector<16x1xf32>
    %125 = vector.broadcast %124 : vector<16x1xf32> to vector<16x8xf32>
    %126 = arith.select %123, %125, %96 : vector<16x8xi1>, vector<16x8xf32>
    %127 = vector.shape_cast %109 : vector<16x1xi32> to vector<16x1xi32>
    %128 = vector.broadcast %127 : vector<16x1xi32> to vector<16x8xi32>
    %129 = arith.select %123, %128, %99 : vector<16x8xi1>, vector<16x8xi32>
    %cst_32 = arith.constant dense<0xFF800000> : vector<16xf32>
    %130 = vector.multi_reduction <maximumf>, %113, %cst_32 [1] : vector<16x128xf32> to vector<16xf32>
    %131 = vector.shape_cast %130 : vector<16xf32> to vector<16x1xf32>
    %132 = vector.broadcast %131 : vector<16x1xf32> to vector<16x128xf32>
    %133 = arith.cmpf oeq, %113, %132 : vector<16x128xf32>
    %c0_i32_33 = arith.constant 0 : i32
    %134 = vector.broadcast %c0_i32_33 : i32 to vector<16x128xi32>
    %135 = arith.select %133, %5, %134 : vector<16x128xi1>, vector<16x128xi32>
    %cst_34 = arith.constant dense<-2147483648> : vector<16xi32>
    %136 = vector.multi_reduction <maxsi>, %135, %cst_34 [1] : vector<16x128xi32> to vector<16xi32>
    %137 = vector.shape_cast %136 : vector<16xi32> to vector<16x1xi32>
    %c128_i32_35 = arith.constant 128 : i32
    %138 = vector.broadcast %c128_i32_35 : i32 to vector<16x1xi32>
    %139 = arith.subi %138, %137 : vector<16x1xi32>
    %140 = vector.broadcast %139 : vector<16x1xi32> to vector<16x128xi32>
    %141 = arith.cmpi eq, %3, %140 : vector<16x128xi32>
    %cst_36 = arith.constant -1.000000e+30 : f32
    %142 = vector.broadcast %cst_36 : f32 to vector<16x128xf32>
    %143 = arith.select %141, %142, %113 : vector<16x128xi1>, vector<16x128xf32>
    %144 = arith.subf %131, %12 : vector<16x1xf32>
    %145 = math.exp %144 : vector<16x1xf32>
    %146 = arith.addf %116, %145 : vector<16x1xf32>
    %cst_37 = arith.constant 0.000000e+00 : f32
    %147 = vector.shape_cast %145 : vector<16x1xf32> to vector<16x1xf32>
    %148 = vector.broadcast %147 : vector<16x1xf32> to vector<16x128xf32>
    %149 = vector.broadcast %cst_37 : f32 to vector<16x128xf32>
    %150 = arith.select %141, %148, %149 : vector<16x128xi1>, vector<16x128xf32>
    %151 = arith.addf %121, %150 : vector<16x128xf32>
    %c4_i32 = arith.constant 4 : i32
    %152 = vector.broadcast %c4_i32 : i32 to vector<16x8xi32>
    %153 = arith.cmpi eq, %6, %152 : vector<16x8xi32>
    %154 = vector.shape_cast %145 : vector<16x1xf32> to vector<16x1xf32>
    %155 = vector.broadcast %154 : vector<16x1xf32> to vector<16x8xf32>
    %156 = arith.select %153, %155, %126 : vector<16x8xi1>, vector<16x8xf32>
    %157 = vector.shape_cast %139 : vector<16x1xi32> to vector<16x1xi32>
    %158 = vector.broadcast %157 : vector<16x1xi32> to vector<16x8xi32>
    %159 = arith.select %153, %158, %129 : vector<16x8xi1>, vector<16x8xi32>
    %cst_38 = arith.constant dense<0xFF800000> : vector<16xf32>
    %160 = vector.multi_reduction <maximumf>, %143, %cst_38 [1] : vector<16x128xf32> to vector<16xf32>
    %161 = vector.shape_cast %160 : vector<16xf32> to vector<16x1xf32>
    %162 = vector.broadcast %161 : vector<16x1xf32> to vector<16x128xf32>
    %163 = arith.cmpf oeq, %143, %162 : vector<16x128xf32>
    %c0_i32_39 = arith.constant 0 : i32
    %164 = vector.broadcast %c0_i32_39 : i32 to vector<16x128xi32>
    %165 = arith.select %163, %5, %164 : vector<16x128xi1>, vector<16x128xi32>
    %cst_40 = arith.constant dense<-2147483648> : vector<16xi32>
    %166 = vector.multi_reduction <maxsi>, %165, %cst_40 [1] : vector<16x128xi32> to vector<16xi32>
    %167 = vector.shape_cast %166 : vector<16xi32> to vector<16x1xi32>
    %c128_i32_41 = arith.constant 128 : i32
    %168 = vector.broadcast %c128_i32_41 : i32 to vector<16x1xi32>
    %169 = arith.subi %168, %167 : vector<16x1xi32>
    %170 = vector.broadcast %169 : vector<16x1xi32> to vector<16x128xi32>
    %171 = arith.cmpi eq, %3, %170 : vector<16x128xi32>
    %cst_42 = arith.constant -1.000000e+30 : f32
    %172 = vector.broadcast %cst_42 : f32 to vector<16x128xf32>
    %173 = arith.select %171, %172, %143 : vector<16x128xi1>, vector<16x128xf32>
    %174 = arith.subf %161, %12 : vector<16x1xf32>
    %175 = math.exp %174 : vector<16x1xf32>
    %176 = arith.addf %146, %175 : vector<16x1xf32>
    %cst_43 = arith.constant 0.000000e+00 : f32
    %177 = vector.shape_cast %175 : vector<16x1xf32> to vector<16x1xf32>
    %178 = vector.broadcast %177 : vector<16x1xf32> to vector<16x128xf32>
    %179 = vector.broadcast %cst_43 : f32 to vector<16x128xf32>
    %180 = arith.select %171, %178, %179 : vector<16x128xi1>, vector<16x128xf32>
    %181 = arith.addf %151, %180 : vector<16x128xf32>
    %c5_i32 = arith.constant 5 : i32
    %182 = vector.broadcast %c5_i32 : i32 to vector<16x8xi32>
    %183 = arith.cmpi eq, %6, %182 : vector<16x8xi32>
    %184 = vector.shape_cast %175 : vector<16x1xf32> to vector<16x1xf32>
    %185 = vector.broadcast %184 : vector<16x1xf32> to vector<16x8xf32>
    %186 = arith.select %183, %185, %156 : vector<16x8xi1>, vector<16x8xf32>
    %187 = vector.shape_cast %169 : vector<16x1xi32> to vector<16x1xi32>
    %188 = vector.broadcast %187 : vector<16x1xi32> to vector<16x8xi32>
    %189 = arith.select %183, %188, %159 : vector<16x8xi1>, vector<16x8xi32>
    %cst_44 = arith.constant dense<0xFF800000> : vector<16xf32>
    %190 = vector.multi_reduction <maximumf>, %173, %cst_44 [1] : vector<16x128xf32> to vector<16xf32>
    %191 = vector.shape_cast %190 : vector<16xf32> to vector<16x1xf32>
    %192 = vector.broadcast %191 : vector<16x1xf32> to vector<16x128xf32>
    %193 = arith.cmpf oeq, %173, %192 : vector<16x128xf32>
    %c0_i32_45 = arith.constant 0 : i32
    %194 = vector.broadcast %c0_i32_45 : i32 to vector<16x128xi32>
    %195 = arith.select %193, %5, %194 : vector<16x128xi1>, vector<16x128xi32>
    %cst_46 = arith.constant dense<-2147483648> : vector<16xi32>
    %196 = vector.multi_reduction <maxsi>, %195, %cst_46 [1] : vector<16x128xi32> to vector<16xi32>
    %197 = vector.shape_cast %196 : vector<16xi32> to vector<16x1xi32>
    %c128_i32_47 = arith.constant 128 : i32
    %198 = vector.broadcast %c128_i32_47 : i32 to vector<16x1xi32>
    %199 = arith.subi %198, %197 : vector<16x1xi32>
    %200 = vector.broadcast %199 : vector<16x1xi32> to vector<16x128xi32>
    %201 = arith.cmpi eq, %3, %200 : vector<16x128xi32>
    %cst_48 = arith.constant -1.000000e+30 : f32
    %202 = vector.broadcast %cst_48 : f32 to vector<16x128xf32>
    %203 = arith.select %201, %202, %173 : vector<16x128xi1>, vector<16x128xf32>
    %204 = arith.subf %191, %12 : vector<16x1xf32>
    %205 = math.exp %204 : vector<16x1xf32>
    %206 = arith.addf %176, %205 : vector<16x1xf32>
    %cst_49 = arith.constant 0.000000e+00 : f32
    %207 = vector.shape_cast %205 : vector<16x1xf32> to vector<16x1xf32>
    %208 = vector.broadcast %207 : vector<16x1xf32> to vector<16x128xf32>
    %209 = vector.broadcast %cst_49 : f32 to vector<16x128xf32>
    %210 = arith.select %201, %208, %209 : vector<16x128xi1>, vector<16x128xf32>
    %211 = arith.addf %181, %210 : vector<16x128xf32>
    %c6_i32 = arith.constant 6 : i32
    %212 = vector.broadcast %c6_i32 : i32 to vector<16x8xi32>
    %213 = arith.cmpi eq, %6, %212 : vector<16x8xi32>
    %214 = vector.shape_cast %205 : vector<16x1xf32> to vector<16x1xf32>
    %215 = vector.broadcast %214 : vector<16x1xf32> to vector<16x8xf32>
    %216 = arith.select %213, %215, %186 : vector<16x8xi1>, vector<16x8xf32>
    %217 = vector.shape_cast %199 : vector<16x1xi32> to vector<16x1xi32>
    %218 = vector.broadcast %217 : vector<16x1xi32> to vector<16x8xi32>
    %219 = arith.select %213, %218, %189 : vector<16x8xi1>, vector<16x8xi32>
    %cst_50 = arith.constant dense<0xFF800000> : vector<16xf32>
    %220 = vector.multi_reduction <maximumf>, %203, %cst_50 [1] : vector<16x128xf32> to vector<16xf32>
    %221 = vector.shape_cast %220 : vector<16xf32> to vector<16x1xf32>
    %222 = vector.broadcast %221 : vector<16x1xf32> to vector<16x128xf32>
    %223 = arith.cmpf oeq, %203, %222 : vector<16x128xf32>
    %c0_i32_51 = arith.constant 0 : i32
    %224 = vector.broadcast %c0_i32_51 : i32 to vector<16x128xi32>
    %225 = arith.select %223, %5, %224 : vector<16x128xi1>, vector<16x128xi32>
    %cst_52 = arith.constant dense<-2147483648> : vector<16xi32>
    %226 = vector.multi_reduction <maxsi>, %225, %cst_52 [1] : vector<16x128xi32> to vector<16xi32>
    %227 = vector.shape_cast %226 : vector<16xi32> to vector<16x1xi32>
    %c128_i32_53 = arith.constant 128 : i32
    %228 = vector.broadcast %c128_i32_53 : i32 to vector<16x1xi32>
    %229 = arith.subi %228, %227 : vector<16x1xi32>
    %230 = vector.broadcast %229 : vector<16x1xi32> to vector<16x128xi32>
    %231 = arith.cmpi eq, %3, %230 : vector<16x128xi32>
    %232 = arith.subf %221, %12 : vector<16x1xf32>
    %233 = math.exp %232 : vector<16x1xf32>
    %234 = arith.addf %206, %233 : vector<16x1xf32>
    %cst_54 = arith.constant 0.000000e+00 : f32
    %235 = vector.shape_cast %233 : vector<16x1xf32> to vector<16x1xf32>
    %236 = vector.broadcast %235 : vector<16x1xf32> to vector<16x128xf32>
    %237 = vector.broadcast %cst_54 : f32 to vector<16x128xf32>
    %238 = arith.select %231, %236, %237 : vector<16x128xi1>, vector<16x128xf32>
    %239 = arith.addf %211, %238 : vector<16x128xf32>
    %c7_i32 = arith.constant 7 : i32
    %240 = vector.broadcast %c7_i32 : i32 to vector<16x8xi32>
    %241 = arith.cmpi eq, %6, %240 : vector<16x8xi32>
    %242 = vector.shape_cast %233 : vector<16x1xf32> to vector<16x1xf32>
    %243 = vector.broadcast %242 : vector<16x1xf32> to vector<16x8xf32>
    %244 = arith.select %241, %243, %216 : vector<16x8xi1>, vector<16x8xf32>
    %245 = vector.shape_cast %229 : vector<16x1xi32> to vector<16x1xi32>
    %246 = vector.broadcast %245 : vector<16x1xi32> to vector<16x8xi32>
    %247 = arith.select %241, %246, %219 : vector<16x8xi1>, vector<16x8xi32>
    %248 = tpu.reciprocal %234 {approx = true} : vector<16x1xf32> -> vector<16x1xf32>
    %249 = arith.mulf %234, %248 : vector<16x1xf32>
    %cst_55 = arith.constant 2.000000e+00 : f32
    %250 = vector.broadcast %cst_55 : f32 to vector<16x1xf32>
    %251 = arith.subf %250, %249 : vector<16x1xf32>
    %252 = arith.mulf %248, %251 : vector<16x1xf32>
    %253 = vector.broadcast %252 : vector<16x1xf32> to vector<16x8xf32>
    %254 = arith.mulf %244, %253 : vector<16x8xf32>
    %c0_56 = arith.constant 0 : index
    %c0_57 = arith.constant 0 : index
    %255 = vector.load %arg3[%c0_56, %c0_57] : memref<128x32xf32, #tpu.memory_space<vmem>>, vector<128x32xf32>
    %cst_58 = arith.constant dense<0.000000e+00> : vector<16x32xf32>
    %256 = tpu.matmul %239, %255, %cst_58 {dimension_numbers = #tpu.dot_dimension_numbers<[1], [0], [0], [1], [0, 0, 1, 1], [], []>} : vector<16x128xf32>, vector<128x32xf32>, vector<16x32xf32> -> vector<16x32xf32>
    %257 = vector.broadcast %252 : vector<16x1xf32> to vector<16x32xf32>
    %258 = arith.mulf %256, %257 : vector<16x32xf32>
    %c0_59 = arith.constant 0 : index
    %c0_60 = arith.constant 0 : index
    %259 = vector.load %arg4[%c0_59, %c0_60] : memref<16x128xf32, #tpu.memory_space<vmem>>, vector<16x32xf32>
    tpu.vector_store %arg4[%c0_59, %c0_60], %258 {strides = array<i32>} : memref<16x128xf32, #tpu.memory_space<vmem>>, vector<16x32xf32>,
    %c0_61 = arith.constant 0 : index
    %c32 = arith.constant 32 : index
    %260 = vector.load %arg4[%c0_61, %c32] : memref<16x128xf32, #tpu.memory_space<vmem>>, vector<16x8xf32>
    tpu.vector_store %arg4[%c0_61, %c32], %254 {strides = array<i32>} : memref<16x128xf32, #tpu.memory_space<vmem>>, vector<16x8xf32>,
    %261 = arith.sitofp %247 : vector<16x8xi32> to vector<16x8xf32>
    %c0_62 = arith.constant 0 : index
    %c40 = arith.constant 40 : index
    %262 = vector.load %arg4[%c0_62, %c40] : memref<16x128xf32, #tpu.memory_space<vmem>>, vector<16x8xf32>
    tpu.vector_store %arg4[%c0_62, %c40], %261 {strides = array<i32>} : memref<16x128xf32, #tpu.memory_space<vmem>>, vector<16x8xf32>,
    %cst_63 = arith.constant 0.000000e+00 : f32
    %263 = vector.broadcast %cst_63 : f32 to vector<16x80xf32>
    %c0_64 = arith.constant 0 : index
    %c48 = arith.constant 48 : index
    %264 = vector.load %arg4[%c0_64, %c48] : memref<16x128xf32, #tpu.memory_space<vmem>>, vector<16x80xf32>
    tpu.vector_store %arg4[%c0_64, %c48], %263 {strides = array<i32>} : memref<16x128xf32, #tpu.memory_space<vmem>>, vector<16x80xf32>,
    return
  }
  func.func @transform_0(%arg0: i32) -> (i32, i32) {
    %c0_i32 = arith.constant 0 : i32
    %c0_i32_0 = arith.constant 0 : i32
    return %arg0, %c0_i32 : i32, i32
  }
  func.func @transform_1(%arg0: i32) -> (i32, i32) {
    %c0_i32 = arith.constant 0 : i32
    %c0_i32_0 = arith.constant 0 : i32
    %c0_i32_1 = arith.constant 0 : i32
    return %c0_i32, %c0_i32_0 : i32, i32
  }
  func.func @transform_2(%arg0: i32) -> (i32, i32) {
    %c0_i32 = arith.constant 0 : i32
    %c0_i32_0 = arith.constant 0 : i32
    %c0_i32_1 = arith.constant 0 : i32
    return %c0_i32, %c0_i32_0 : i32, i32
  }
  func.func @transform_3(%arg0: i32) -> (i32, i32) {
    %c0_i32 = arith.constant 0 : i32
    %c0_i32_0 = arith.constant 0 : i32
    return %arg0, %c0_i32 : i32, i32
  }
}

</mosaic_0001>

<bundles_post_ra>
// kernel: tpu_custom_call.1
= control target key start
LH: loop header
LB: loop body
LE: loop exit
PB: predicated region body
PF: predicated region fallthrough
CT: control target
= control target key end

     0   :  { %vm19_vm0 = vcmask 130048   ;;  %s1182_s0 = inlined_call_operand.vmem [shape: f32[16,16], index: 0, kind: input, shape index: {}]   ;;  %s1183_s1 = inlined_call_operand.vmem [shape: f32[16,128], index: 1, kind: input, shape index: {}]   ;;  %s1184_s2 = inlined_call_operand.vmem [shape: f32[128,32], index: 2, kind: input, shape index: {}]   ;;  %s1185_s3 = inlined_call_operand.hbm [shape: f32[16,128], index: 3, kind: output, shape index: {}]  }
   0x1   :  { %v18_v0 = vld [vmem:[%s1183_s1 + $0x8] sm:$0xff]  ;;  %v17_v1 = vld [vmem:[%s1183_s1] sm:$0xff] }
   0x2   :  { %v15_v2 = vld [vmem:[%s1182_s0] sm:$0xff]  ;;  %738 = vmatprep.subr.mxu0 %v18_v0 }
   0x3   :  { %742 = vmatprep.mubr.msk.f32.mxu0 %vm19_vm0, %v15_v2 }
   0x4   :  { %8 = vsyncpa [#allocation3], 0  ;;  %739 = vmatpush3.msra.mxu0 %v18_v0  ;;  %v16_v3 = vld [vmem:[%s1182_s0 + $0x8] sm:$0xff]  ;;  %v101_v6 = vlaneseq  ;;  %s841_s21 = smov 32   ;;  %s843_s22 = smov [#allocation2]  }
   0x5   :  { %740 = vmatprep.subr.mxu0 %v17_v1  ;;  %s703_s23 = sshll.u32 %s843_s22, 4  ;;  %s704_s23 = int_to_ptr.vmem [resolvable:$true] %s703_s23 }
   0x6   :  { %741 = vmatpush3.msra.mxu0 %v17_v1  ;;  %v878_v7 = vand.u32 127, %v101_v6  ;;  %s818_s24 = scalar_lea.vmem %s704_s23, 256  ;;  %p823_p1 = scmp.lt.s32.totalorder %s704_s23, %s704_s23 }
   0x7   :  { %743 = vmatmul.mubr.msk.f32.vlgmr.msra.gmra.mxu0 %vm19_vm0, %v16_v3  ;;  %p819_p0 = scmp.ne.s32.totalorder %s704_s23, %s818_s24  ;;  %p824_p2 = scmp.lt.s32.totalorder %s818_s24, %s818_s24 }
   0x8   :  { %v881_v8 = vsub.s32 128, %v878_v7  ;;  %vm150_vm11 = vcmp.eq.s32.totalorder %v878_v7, 0  ;;  %vm208_vm12 = vcmp.eq.s32.totalorder %v878_v7, 1 }
   0x9   :  { %p825_p3 = por %p824_p2, %p823_p1 }
   0xb   :  { %p826_p4 = pnand %p825_p3, %p819_p0 }
  0xc7   :  { %v744_v4 = vpop.f32.mrf.mxu0 }
  0xc9   :  { %v92_v5 = vpop.f32.mrf.mxu0 }
  0xca   :  { %104 = vmax.xlane.f32.xlu0 %v92_v5 }
  0xce   :  { %106 = vmax.xlane.f32.xlu0 %v744_v4 }
 0x153   :  { %v883_v9 = vpop.xlane.xlu0 %104 }
 0x154   :  { %vm108_vm1 = vcmp.eq.f32.partialorder %v92_v5, %v883_v9 }
 0x155   :  { %v110_v10 = vsel %vm108_vm1, %v881_v8, 0 }
 0x156   :  { %v113_v11 = vshra.s32 %v110_v10, 16  ;;  %v112_v17 = vand.u32 65535, %v110_v10 }
 0x157   :  { %v887_v12 = vpop.xlane.xlu0 %106 }
 0x158   :  { %v115_v13 = vcvt.s32.f32 %v113_v11  ;;  %vm109_vm2 = vcmp.eq.f32.partialorder %v744_v4, %v887_v12  ;;  %v114_v19 = vcvt.s32.f32 %v112_v17 }
 0x159   :  { %v111_v14 = vsel %vm109_vm2, %v881_v8, 0 }
 0x15a   :  { %116 = vmax.xlane.f32.xlu1 %v115_v13  ;;  %v127_v15 = vshra.s32 %v111_v14, 16  ;;  %v126_v20 = vand.u32 65535, %v111_v14 }
 0x15c   :  { %v129_v16 = vcvt.s32.f32 %v127_v15  ;;  %v128_v23 = vcvt.s32.f32 %v126_v20  ;;  %v840_v15 = vmov 0.0  }
 0x15e   :  { %130 = vmax.xlane.f32.xlu1 %v129_v16 }
 0x1e3   :  { %v117_v18 = vpop.xlane.xlu1 %116 }
 0x1e4   :  { %vm118_vm3 = vcmp.eq.f32.partialorder %v115_v13, %v117_v18  ;;  %v123_v25 = vcvt.f32.s32 %v117_v18 }
 0x1e5   :  { %v119_v21 = vsel %vm118_vm3, %v114_v19, -inf  ;;  %vm267_vm3 = vcmp.eq.s32.totalorder %v878_v7, 2 }
 0x1e6   :  { %120 = vmax.xlane.f32.xlu0 %v119_v21  ;;  %v124_v27 = vshll.u32 %v123_v25, 16 }
 0x1e7   :  { %v131_v22 = vpop.xlane.xlu1 %130 }
 0x1e8   :  { %vm132_vm4 = vcmp.eq.f32.partialorder %v129_v16, %v131_v22  ;;  %v137_v28 = vcvt.f32.s32 %v131_v22 }
 0x1e9   :  { %v133_v24 = vsel %vm132_vm4, %v128_v23, -inf }
 0x1ea   :  { %134 = vmax.xlane.f32.xlu1 %v133_v24  ;;  %v138_v32 = vshll.u32 %v137_v28, 16 }
 0x26f   :  { %v121_v26 = vpop.xlane.xlu0 %120 }
 0x270   :  { %v122_v29 = vcvt.f32.s32 %v121_v26 }
 0x272   :  { %v125_v30 = vadd.s32 %v124_v27, %v122_v29 }
 0x273   :  { %v135_v31 = vpop.xlane.xlu1 %134 }
 0x274   :  { %v140_v33 = vsub.s32 128, %v125_v30  ;;  %v136_v34 = vcvt.f32.s32 %v135_v31 }
 0x276   :  { %v891_v35 = vadd.s32 %v138_v32, %v136_v34  ;;  %vm894_vm5 = vcmp.eq.s32.totalorder %v878_v7, %v140_v33  ;;  %v152_v10 = vsel %vm150_vm11, %v140_v33, 0 }
 0x277   :  { %v144_v37 = vsel %vm894_vm5, -1e+30, %v92_v5  ;;  %v146_v16 = vsel %vm894_vm5, 1.0, %v840_v15 }
 0x278   :  { %v141_v38 = vsub.s32 128, %v891_v35  ;;  %154 = vmax.xlane.f32.xlu0 %v144_v37 }
 0x27a   :  { %vm902_vm6 = vcmp.eq.s32.totalorder %v878_v7, %v141_v38  ;;  %v153_v21 = vsel %vm150_vm11, %v141_v38, 0 }
 0x27b   :  { %v145_v40 = vsel %vm902_vm6, -1e+30, %v744_v4  ;;  %v147_v24 = vsel %vm902_vm6, 1.0, %v840_v15 }
 0x27c   :  { %156 = vmax.xlane.f32.xlu1 %v145_v40 }
 0x301   :  { %v155_v41 = vpop.xlane.xlu0 %154 }
 0x302   :  { %vm158_vm7 = vcmp.eq.f32.partialorder %v144_v37, %v155_v41  ;;  %v196_v57 = vsub.f32 %v155_v41, %v883_v9 }
 0x303   :  { %v160_v42 = vsel %vm158_vm7, %v881_v8, 0 }
 0x304   :  { %v163_v43 = vshra.s32 %v160_v42, 16  ;;  %v162_v49 = vand.u32 65535, %v160_v42  ;;  %v198_v58 = vmul.f32 1.442695, %v196_v57 }
 0x305   :  { %v157_v44 = vpop.xlane.xlu1 %156 }
 0x306   :  { %vm159_vm8 = vcmp.eq.f32.partialorder %v145_v40, %v157_v44  ;;  %v165_v45 = vcvt.s32.f32 %v163_v43  ;;  %v164_v51 = vcvt.s32.f32 %v162_v49  ;;  %v197_v59 = vsub.f32 %v157_v44, %v887_v12 }
 0x307   :  { %v161_v46 = vsel %vm159_vm8, %v881_v8, 0  ;;  %786 = vpow2.f32 %v198_v58 }
 0x308   :  { %166 = vmax.xlane.f32.xlu0 %v165_v45  ;;  %v177_v47 = vshra.s32 %v161_v46, 16  ;;  %v176_v52 = vand.u32 65535, %v161_v46  ;;  %v200_v60 = vmul.f32 1.442695, %v197_v59 }
 0x30a   :  { %v179_v48 = vcvt.s32.f32 %v177_v47  ;;  %v178_v55 = vcvt.s32.f32 %v176_v52  ;;  %788 = vpow2.f32 %v200_v60 }
 0x30c   :  { %180 = vmax.xlane.f32.xlu1 %v179_v48 }
 0x314   :  { %v916_v11 = vpop.eup %786 }
 0x317   :  { %v927_v22 = vpop.eup %788 }
 0x391   :  { %v167_v50 = vpop.xlane.xlu0 %166 }
 0x392   :  { %vm168_vm9 = vcmp.eq.f32.partialorder %v165_v45, %v167_v50  ;;  %v173_v61 = vcvt.f32.s32 %v167_v50 }
 0x393   :  { %v169_v53 = vsel %vm168_vm9, %v164_v51, -inf }
 0x394   :  { %170 = vmax.xlane.f32.xlu0 %v169_v53  ;;  %v174_v63 = vshll.u32 %v173_v61, 16 }
 0x395   :  { %v181_v54 = vpop.xlane.xlu1 %180 }
 0x396   :  { %vm182_vm10 = vcmp.eq.f32.partialorder %v179_v48, %v181_v54  ;;  %v187_v0 = vcvt.f32.s32 %v181_v54 }
 0x397   :  { %v183_v56 = vsel %vm182_vm10, %v178_v55, -inf  ;;  %vm326_vm10 = vcmp.eq.s32.totalorder %v878_v7, 3 }
 0x398   :  { %184 = vmax.xlane.f32.xlu1 %v183_v56  ;;  %v188_v4 = vshll.u32 %v187_v0, 16 }
 0x41d   :  { %v171_v62 = vpop.xlane.xlu0 %170 }
 0x41e   :  { %v172_v1 = vcvt.f32.s32 %v171_v62 }
 0x420   :  { %v175_v2 = vadd.s32 %v174_v63, %v172_v1 }
 0x421   :  { %v185_v3 = vpop.xlane.xlu1 %184 }
 0x422   :  { %v190_v5 = vsub.s32 128, %v175_v2  ;;  %v186_v6 = vcvt.f32.s32 %v185_v3 }
 0x424   :  { %v211_v13 = vsel %vm208_vm12, %v190_v5, %v152_v10  ;;  %v189_v14 = vadd.s32 %v188_v4, %v186_v6  ;;  %vm192_vm13 = vcmp.eq.s32.totalorder %v878_v7, %v190_v5 }
 0x425   :  { %v194_v17 = vsel %vm192_vm13, -1e+30, %v144_v37  ;;  %v204_v18 = vsel %vm192_vm13, %v916_v11, 0.0 }
 0x426   :  { %v191_v19 = vsub.s32 128, %v189_v14  ;;  %v206_v20 = vadd.f32 %v204_v18, %v146_v16  ;;  %213 = vmax.xlane.f32.xlu0 %v194_v17 }
 0x428   :  { %v212_v23 = vsel %vm208_vm12, %v191_v19, %v153_v21  ;;  %vm193_vm14 = vcmp.eq.s32.totalorder %v878_v7, %v191_v19 }
 0x429   :  { %v195_v25 = vsel %vm193_vm14, -1e+30, %v145_v40  ;;  %v205_v26 = vsel %vm193_vm14, %v927_v22, 0.0 }
 0x42a   :  { %v207_v27 = vadd.f32 %v205_v26, %v147_v24  ;;  %215 = vmax.xlane.f32.xlu1 %v195_v25 }
 0x4af   :  { %v214_v28 = vpop.xlane.xlu0 %213 }
 0x4b0   :  { %vm217_vm15 = vcmp.eq.f32.partialorder %v194_v17, %v214_v28  ;;  %v255_v44 = vsub.f32 %v214_v28, %v883_v9 }
 0x4b1   :  { %v219_v29 = vsel %vm217_vm15, %v881_v8, 0 }
 0x4b2   :  { %v222_v30 = vshra.s32 %v219_v29, 16  ;;  %v221_v36 = vand.u32 65535, %v219_v29  ;;  %v257_v45 = vmul.f32 1.442695, %v255_v44 }
 0x4b3   :  { %v216_v31 = vpop.xlane.xlu1 %215 }
 0x4b4   :  { %vm218_vm0 = vcmp.eq.f32.partialorder %v195_v25, %v216_v31  ;;  %v224_v32 = vcvt.s32.f32 %v222_v30  ;;  %v223_v38 = vcvt.s32.f32 %v221_v36  ;;  %v256_v46 = vsub.f32 %v216_v31, %v887_v12 }
 0x4b5   :  { %v220_v33 = vsel %vm218_vm0, %v881_v8, 0  ;;  %790 = vpow2.f32 %v257_v45 }
 0x4b6   :  { %225 = vmax.xlane.f32.xlu0 %v224_v32  ;;  %v236_v34 = vshra.s32 %v220_v33, 16  ;;  %v235_v39 = vand.u32 65535, %v220_v33  ;;  %v259_v47 = vmul.f32 1.442695, %v256_v46 }
 0x4b8   :  { %v238_v35 = vcvt.s32.f32 %v236_v34  ;;  %v237_v42 = vcvt.s32.f32 %v235_v39  ;;  %792 = vpow2.f32 %v259_v47 }
 0x4ba   :  { %239 = vmax.xlane.f32.xlu1 %v238_v35 }
 0x4c2   :  { %v941_v58 = vpop.eup %790 }
 0x4c5   :  { %v947_v1 = vpop.eup %792 }
 0x53f   :  { %v226_v37 = vpop.xlane.xlu0 %225 }
 0x540   :  { %vm227_vm1 = vcmp.eq.f32.partialorder %v224_v32, %v226_v37  ;;  %v232_v48 = vcvt.f32.s32 %v226_v37 }
 0x541   :  { %v228_v40 = vsel %vm227_vm1, %v223_v38, -inf }
 0x542   :  { %229 = vmax.xlane.f32.xlu0 %v228_v40  ;;  %v233_v50 = vshll.u32 %v232_v48, 16 }
 0x543   :  { %v240_v41 = vpop.xlane.xlu1 %239 }
 0x544   :  { %vm241_vm2 = vcmp.eq.f32.partialorder %v238_v35, %v240_v41  ;;  %v246_v51 = vcvt.f32.s32 %v240_v41 }
 0x545   :  { %v242_v43 = vsel %vm241_vm2, %v237_v42, -inf }
 0x546   :  { %243 = vmax.xlane.f32.xlu1 %v242_v43  ;;  %v247_v55 = vshll.u32 %v246_v51, 16 }
 0x5cb   :  { %v230_v49 = vpop.xlane.xlu0 %229 }
 0x5cc   :  { %v231_v52 = vcvt.f32.s32 %v230_v49 }
 0x5ce   :  { %v234_v53 = vadd.s32 %v233_v50, %v231_v52 }
 0x5cf   :  { %v244_v54 = vpop.xlane.xlu1 %243 }
 0x5d0   :  { %v249_v56 = vsub.s32 128, %v234_v53  ;;  %v245_v57 = vcvt.f32.s32 %v244_v54 }
 0x5d2   :  { %v270_v59 = vsel %vm267_vm3, %v249_v56, %v211_v13  ;;  %v248_v60 = vadd.s32 %v247_v55, %v245_v57  ;;  %vm251_vm4 = vcmp.eq.s32.totalorder %v878_v7, %v249_v56 }
 0x5d3   :  { %v253_v61 = vsel %vm251_vm4, -1e+30, %v194_v17  ;;  %v263_v62 = vsel %vm251_vm4, %v941_v58, 0.0  ;;  %vm385_vm4 = vcmp.eq.s32.totalorder %v878_v7, 4 }
 0x5d4   :  { %v250_v63 = vsub.s32 128, %v248_v60  ;;  %v265_v0 = vadd.f32 %v263_v62, %v206_v20  ;;  %272 = vmax.xlane.f32.xlu0 %v253_v61 }
 0x5d6   :  { %v271_v2 = vsel %vm267_vm3, %v250_v63, %v212_v23  ;;  %vm252_vm5 = vcmp.eq.s32.totalorder %v878_v7, %v250_v63 }
 0x5d7   :  { %v254_v3 = vsel %vm252_vm5, -1e+30, %v195_v25  ;;  %v264_v4 = vsel %vm252_vm5, %v947_v1, 0.0 }
 0x5d8   :  { %v266_v5 = vadd.f32 %v264_v4, %v207_v27  ;;  %274 = vmax.xlane.f32.xlu1 %v254_v3 }
 0x65d   :  { %v273_v6 = vpop.xlane.xlu0 %272 }
 0x65e   :  { %vm276_vm6 = vcmp.eq.f32.partialorder %v253_v61, %v273_v6  ;;  %v314_v29 = vsub.f32 %v273_v6, %v883_v9 }
 0x65f   :  { %v278_v10 = vsel %vm276_vm6, %v881_v8, 0 }
 0x660   :  { %v281_v13 = vshra.s32 %v278_v10, 16  ;;  %v280_v20 = vand.u32 65535, %v278_v10  ;;  %v316_v30 = vmul.f32 1.442695, %v314_v29 }
 0x661   :  { %v275_v14 = vpop.xlane.xlu1 %274 }
 0x662   :  { %vm277_vm7 = vcmp.eq.f32.partialorder %v254_v3, %v275_v14  ;;  %v283_v16 = vcvt.s32.f32 %v281_v13  ;;  %v282_v23 = vcvt.s32.f32 %v280_v20  ;;  %v315_v31 = vsub.f32 %v275_v14, %v887_v12 }
 0x663   :  { %v279_v17 = vsel %vm277_vm7, %v881_v8, 0  ;;  %794 = vpow2.f32 %v316_v30 }
 0x664   :  { %284 = vmax.xlane.f32.xlu0 %v283_v16  ;;  %v295_v18 = vshra.s32 %v279_v17, 16  ;;  %v294_v24 = vand.u32 65535, %v279_v17  ;;  %v318_v32 = vmul.f32 1.442695, %v315_v31 }
 0x666   :  { %v297_v19 = vcvt.s32.f32 %v295_v18  ;;  %v296_v27 = vcvt.s32.f32 %v294_v24  ;;  %796 = vpow2.f32 %v318_v32 }
 0x668   :  { %298 = vmax.xlane.f32.xlu1 %v297_v19 }
 0x670   :  { %v958_v43 = vpop.eup %794 }
 0x673   :  { %v964_v50 = vpop.eup %796 }
 0x6ed   :  { %v285_v21 = vpop.xlane.xlu0 %284 }
 0x6ee   :  { %vm286_vm8 = vcmp.eq.f32.partialorder %v283_v16, %v285_v21  ;;  %v291_v33 = vcvt.f32.s32 %v285_v21 }
 0x6ef   :  { %v287_v25 = vsel %vm286_vm8, %v282_v23, -inf }
 0x6f0   :  { %288 = vmax.xlane.f32.xlu0 %v287_v25  ;;  %v292_v35 = vshll.u32 %v291_v33, 16 }
 0x6f1   :  { %v299_v26 = vpop.xlane.xlu1 %298 }
 0x6f2   :  { %vm300_vm9 = vcmp.eq.f32.partialorder %v297_v19, %v299_v26  ;;  %v305_v36 = vcvt.f32.s32 %v299_v26 }
 0x6f3   :  { %v301_v28 = vsel %vm300_vm9, %v296_v27, -inf }
 0x6f4   :  { %302 = vmax.xlane.f32.xlu1 %v301_v28  ;;  %v306_v40 = vshll.u32 %v305_v36, 16 }
 0x779   :  { %v289_v34 = vpop.xlane.xlu0 %288 }
 0x77a   :  { %v290_v37 = vcvt.f32.s32 %v289_v34 }
 0x77c   :  { %v293_v38 = vadd.s32 %v292_v35, %v290_v37 }
 0x77d   :  { %v303_v39 = vpop.xlane.xlu1 %302 }
 0x77e   :  { %v308_v41 = vsub.s32 128, %v293_v38  ;;  %v304_v42 = vcvt.f32.s32 %v303_v39 }
 0x780   :  { %v329_v44 = vsel %vm326_vm10, %v308_v41, %v270_v59  ;;  %v307_v45 = vadd.s32 %v306_v40, %v304_v42  ;;  %vm310_vm13 = vcmp.eq.s32.totalorder %v878_v7, %v308_v41 }
 0x781   :  { %v312_v46 = vsel %vm310_vm13, -1e+30, %v253_v61  ;;  %v322_v47 = vsel %vm310_vm13, %v958_v43, 0.0 }
 0x782   :  { %v309_v48 = vsub.s32 128, %v307_v45  ;;  %v324_v49 = vadd.f32 %v322_v47, %v265_v0  ;;  %331 = vmax.xlane.f32.xlu0 %v312_v46 }
 0x784   :  { %v330_v51 = vsel %vm326_vm10, %v309_v48, %v271_v2  ;;  %vm311_vm14 = vcmp.eq.s32.totalorder %v878_v7, %v309_v48 }
 0x785   :  { %v313_v52 = vsel %vm311_vm14, -1e+30, %v254_v3  ;;  %v323_v53 = vsel %vm311_vm14, %v964_v50, 0.0  ;;  %vm444_vm14 = vcmp.eq.s32.totalorder %v878_v7, 5 }
 0x786   :  { %v325_v54 = vadd.f32 %v323_v53, %v266_v5  ;;  %333 = vmax.xlane.f32.xlu1 %v313_v52 }
 0x80b   :  { %v332_v55 = vpop.xlane.xlu0 %331 }
 0x80c   :  { %vm335_vm15 = vcmp.eq.f32.partialorder %v312_v46, %v332_v55  ;;  %v373_v14 = vsub.f32 %v332_v55, %v883_v9 }
 0x80d   :  { %v337_v56 = vsel %vm335_vm15, %v881_v8, 0 }
 0x80e   :  { %v340_v57 = vshra.s32 %v337_v56, 16  ;;  %v339_v0 = vand.u32 65535, %v337_v56  ;;  %v375_v16 = vmul.f32 1.442695, %v373_v14 }
 0x80f   :  { %v334_v59 = vpop.xlane.xlu1 %333 }
 0x810   :  { %vm336_vm0 = vcmp.eq.f32.partialorder %v313_v52, %v334_v59  ;;  %v342_v60 = vcvt.s32.f32 %v340_v57  ;;  %v341_v3 = vcvt.s32.f32 %v339_v0  ;;  %v374_v17 = vsub.f32 %v334_v59, %v887_v12 }
 0x811   :  { %v338_v61 = vsel %vm336_vm0, %v881_v8, 0  ;;  %798 = vpow2.f32 %v375_v16 }
 0x812   :  { %343 = vmax.xlane.f32.xlu0 %v342_v60  ;;  %v354_v62 = vshra.s32 %v338_v61, 16  ;;  %v353_v4 = vand.u32 65535, %v338_v61  ;;  %v377_v18 = vmul.f32 1.442695, %v374_v17 }
 0x814   :  { %v356_v63 = vcvt.s32.f32 %v354_v62  ;;  %v355_v10 = vcvt.s32.f32 %v353_v4  ;;  %800 = vpow2.f32 %v377_v18 }
 0x816   :  { %357 = vmax.xlane.f32.xlu1 %v356_v63 }
 0x81e   :  { %v975_v30 = vpop.eup %798 }
 0x821   :  { %v981_v37 = vpop.eup %800 }
 0x89b   :  { %v344_v2 = vpop.xlane.xlu0 %343 }
 0x89c   :  { %vm345_vm1 = vcmp.eq.f32.partialorder %v342_v60, %v344_v2  ;;  %v350_v19 = vcvt.f32.s32 %v344_v2 }
 0x89d   :  { %v346_v5 = vsel %vm345_vm1, %v341_v3, -inf }
 0x89e   :  { %347 = vmax.xlane.f32.xlu0 %v346_v5  ;;  %v351_v21 = vshll.u32 %v350_v19, 16 }
 0x89f   :  { %v358_v6 = vpop.xlane.xlu1 %357 }
 0x8a0   :  { %vm359_vm2 = vcmp.eq.f32.partialorder %v356_v63, %v358_v6  ;;  %v364_v23 = vcvt.f32.s32 %v358_v6 }
 0x8a1   :  { %v360_v13 = vsel %vm359_vm2, %v355_v10, -inf }
 0x8a2   :  { %361 = vmax.xlane.f32.xlu1 %v360_v13  ;;  %v365_v27 = vshll.u32 %v364_v23, 16 }
 0x927   :  { %v348_v20 = vpop.xlane.xlu0 %347 }
 0x928   :  { %v349_v24 = vcvt.f32.s32 %v348_v20 }
 0x92a   :  { %v352_v25 = vadd.s32 %v351_v21, %v349_v24 }
 0x92b   :  { %v362_v26 = vpop.xlane.xlu1 %361 }
 0x92c   :  { %v367_v28 = vsub.s32 128, %v352_v25  ;;  %v363_v29 = vcvt.f32.s32 %v362_v26 }
 0x92e   :  { %v388_v31 = vsel %vm385_vm4, %v367_v28, %v329_v44  ;;  %v366_v32 = vadd.s32 %v365_v27, %v363_v29  ;;  %vm369_vm5 = vcmp.eq.s32.totalorder %v878_v7, %v367_v28 }
 0x92f   :  { %v371_v33 = vsel %vm369_vm5, -1e+30, %v312_v46  ;;  %v381_v34 = vsel %vm369_vm5, %v975_v30, 0.0 }
 0x930   :  { %v368_v35 = vsub.s32 128, %v366_v32  ;;  %v383_v36 = vadd.f32 %v381_v34, %v324_v49  ;;  %390 = vmax.xlane.f32.xlu0 %v371_v33 }
 0x932   :  { %v389_v38 = vsel %vm385_vm4, %v368_v35, %v330_v51  ;;  %vm370_vm6 = vcmp.eq.s32.totalorder %v878_v7, %v368_v35 }
 0x933   :  { %v372_v39 = vsel %vm370_vm6, -1e+30, %v313_v52  ;;  %v382_v40 = vsel %vm370_vm6, %v981_v37, 0.0 }
 0x934   :  { %v384_v41 = vadd.f32 %v382_v40, %v325_v54  ;;  %392 = vmax.xlane.f32.xlu1 %v372_v39 }
 0x9b9   :  { %v391_v42 = vpop.xlane.xlu0 %390 }
 0x9ba   :  { %vm394_vm7 = vcmp.eq.f32.partialorder %v371_v33, %v391_v42  ;;  %v432_v61 = vsub.f32 %v391_v42, %v883_v9 }
 0x9bb   :  { %v396_v44 = vsel %vm394_vm7, %v881_v8, 0  ;;  %vm503_vm7 = vcmp.eq.s32.totalorder %v878_v7, 6 }
 0x9bc   :  { %v399_v45 = vshra.s32 %v396_v44, 16  ;;  %v398_v53 = vand.u32 65535, %v396_v44  ;;  %v434_v62 = vmul.f32 1.442695, %v432_v61 }
 0x9bd   :  { %v393_v46 = vpop.xlane.xlu1 %392 }
 0x9be   :  { %vm395_vm8 = vcmp.eq.f32.partialorder %v372_v39, %v393_v46  ;;  %v401_v47 = vcvt.s32.f32 %v399_v45  ;;  %v400_v55 = vcvt.s32.f32 %v398_v53  ;;  %v433_v63 = vsub.f32 %v393_v46, %v887_v12 }
 0x9bf   :  { %v397_v48 = vsel %vm395_vm8, %v881_v8, 0  ;;  %802 = vpow2.f32 %v434_v62 }
 0x9c0   :  { %402 = vmax.xlane.f32.xlu0 %v401_v47  ;;  %v413_v49 = vshra.s32 %v397_v48, 16  ;;  %v412_v56 = vand.u32 65535, %v397_v48  ;;  %v436_v0 = vmul.f32 1.442695, %v433_v63 }
 0x9c2   :  { %v415_v51 = vcvt.s32.f32 %v413_v49  ;;  %v414_v59 = vcvt.s32.f32 %v412_v56  ;;  %804 = vpow2.f32 %v436_v0 }
 0x9c4   :  { %416 = vmax.xlane.f32.xlu1 %v415_v51 }
 0x9cc   :  { %v992_v18 = vpop.eup %802 }
 0x9cf   :  { %v998_v26 = vpop.eup %804 }
 0xa49   :  { %v403_v52 = vpop.xlane.xlu0 %402 }
 0xa4a   :  { %vm404_vm9 = vcmp.eq.f32.partialorder %v401_v47, %v403_v52  ;;  %v409_v2 = vcvt.f32.s32 %v403_v52 }
 0xa4b   :  { %v405_v54 = vsel %vm404_vm9, %v400_v55, -inf }
 0xa4c   :  { %406 = vmax.xlane.f32.xlu0 %v405_v54  ;;  %v410_v4 = vshll.u32 %v409_v2, 16 }
 0xa4d   :  { %v417_v57 = vpop.xlane.xlu1 %416 }
 0xa4e   :  { %vm418_vm13 = vcmp.eq.f32.partialorder %v415_v51, %v417_v57  ;;  %v423_v5 = vcvt.f32.s32 %v417_v57 }
 0xa4f   :  { %v419_v60 = vsel %vm418_vm13, %v414_v59, -inf }
 0xa50   :  { %420 = vmax.xlane.f32.xlu1 %v419_v60  ;;  %v424_v14 = vshll.u32 %v423_v5, 16 }
 0xad5   :  { %v407_v3 = vpop.xlane.xlu0 %406 }
 0xad6   :  { %v408_v6 = vcvt.f32.s32 %v407_v3 }
 0xad8   :  { %v411_v10 = vadd.s32 %v410_v4, %v408_v6 }
 0xad9   :  { %v421_v13 = vpop.xlane.xlu1 %420 }
 0xada   :  { %v426_v16 = vsub.s32 128, %v411_v10  ;;  %v422_v17 = vcvt.f32.s32 %v421_v13 }
 0xadc   :  { %v447_v19 = vsel %vm444_vm14, %v426_v16, %v388_v31  ;;  %v425_v20 = vadd.s32 %v424_v14, %v422_v17  ;;  %vm428_vm15 = vcmp.eq.s32.totalorder %v878_v7, %v426_v16 }
 0xadd   :  { %v430_v21 = vsel %vm428_vm15, -1e+30, %v371_v33  ;;  %v440_v23 = vsel %vm428_vm15, %v992_v18, 0.0 }
 0xade   :  { %v427_v24 = vsub.s32 128, %v425_v20  ;;  %449 = vmax.xlane.f32.xlu0 %v430_v21  ;;  %v442_v25 = vadd.f32 %v440_v23, %v383_v36 }
 0xae0   :  { %v448_v27 = vsel %vm444_vm14, %v427_v24, %v389_v38  ;;  %vm429_vm0 = vcmp.eq.s32.totalorder %v878_v7, %v427_v24 }
 0xae1   :  { %v431_v28 = vsel %vm429_vm0, -1e+30, %v372_v39  ;;  %v441_v29 = vsel %vm429_vm0, %v998_v26, 0.0 }
 0xae2   :  { %v443_v31 = vadd.f32 %v441_v29, %v384_v41  ;;  %451 = vmax.xlane.f32.xlu1 %v431_v28 }
 0xb67   :  { %v450_v32 = vpop.xlane.xlu0 %449 }
 0xb68   :  { %vm453_vm1 = vcmp.eq.f32.partialorder %v430_v21, %v450_v32  ;;  %v491_v51 = vsub.f32 %v450_v32, %v883_v9 }
 0xb69   :  { %v455_v33 = vsel %vm453_vm1, %v881_v8, 0 }
 0xb6a   :  { %v458_v34 = vshra.s32 %v455_v33, 16  ;;  %v457_v44 = vand.u32 65535, %v455_v33  ;;  %v493_v53 = vmul.f32 1.442695, %v491_v51  ;;  %v590_v33 = vld [vmem:[%s1184_s2 + $0x78] sm:$0xff] }
 0xb6b   :  { %v452_v35 = vpop.xlane.xlu1 %451  ;;  %745 = vmatprep.subr.mxu1 %v590_v33 }
 0xb6c   :  { %vm454_vm2 = vcmp.eq.f32.partialorder %v431_v28, %v452_v35  ;;  %v460_v36 = vcvt.s32.f32 %v458_v34  ;;  %v459_v45 = vcvt.s32.f32 %v457_v44  ;;  %v492_v52 = vsub.f32 %v452_v35, %v887_v12  ;;  %v589_v34 = vld [vmem:[%s1184_s2 + $0x70] sm:$0xff]  ;;  %746 = vmatpush3.msra.mxu1 %v590_v33  ;;  %v587_v35 = vld [vmem:[%s1184_s2 + $0x60] sm:$0xff]  ;;  %v582_v44 = vld [vmem:[%s1184_s2 + $0x38] sm:$0xff] }
 0xb6d   :  { %v456_v40 = vsel %vm454_vm2, %v881_v8, 0  ;;  %806 = vpow2.f32 %v493_v53  ;;  %747 = vmatprep.subr.mxu1 %v589_v34  ;;  %v580_v33 = vld [vmem:[%s1184_s2 + $0x28] sm:$0xff]  ;;  %vm695_vm2 = vcmask 1047936  }
 0xb6e   :  { %461 = vmax.xlane.f32.xlu0 %v460_v36  ;;  %v472_v42 = vshra.s32 %v456_v40, 16  ;;  %v471_v46 = vand.u32 65535, %v456_v40  ;;  %v495_v55 = vmul.f32 1.442695, %v492_v52  ;;  %748 = vmatpush3.msra.mxu1 %v589_v34  ;;  %v585_v40 = vld [vmem:[%s1184_s2 + $0x50] sm:$0xff] }
 0xb70   :  { %v474_v38 = vcvt.s32.f32 %v472_v42  ;;  %v473_v48 = vcvt.s32.f32 %v471_v46  ;;  %808 = vpow2.f32 %v495_v55  ;;  %v584_v42 = vld [vmem:[%s1184_s2 + $0x48] sm:$0xff] }
 0xb72   :  { %475 = vmax.xlane.f32.xlu1 %v474_v38 }
 0xb7a   :  { %v1009_v3 = vpop.eup %806 }
 0xb7d   :  { %v1019_v16 = vpop.eup %808 }
 0xbf7   :  { %v462_v39 = vpop.xlane.xlu0 %461 }
 0xbf8   :  { %vm463_vm5 = vcmp.eq.f32.partialorder %v460_v36, %v462_v39  ;;  %v468_v56 = vcvt.f32.s32 %v462_v39  ;;  %v586_v36 = vld [vmem:[%s1184_s2 + $0x58] sm:$0xff] }
 0xbf9   :  { %v464_v41 = vsel %vm463_vm5, %v459_v45, -inf }
 0xbfa   :  { %465 = vmax.xlane.f32.xlu0 %v464_v41  ;;  %v469_v57 = vshll.u32 %v468_v56, 16 }
 0xbfb   :  { %v476_v47 = vpop.xlane.xlu1 %475 }
 0xbfc   :  { %vm477_vm6 = vcmp.eq.f32.partialorder %v474_v38, %v476_v47  ;;  %v482_v59 = vcvt.f32.s32 %v476_v47  ;;  %v583_v38 = vld [vmem:[%s1184_s2 + $0x40] sm:$0xff]  ;;  %v203_v47 = vadd.f32 1.0, %v927_v22 }
 0xbfd   :  { %v478_v49 = vsel %vm477_vm6, %v473_v48, -inf  ;;  %v202_v48 = vadd.f32 1.0, %v916_v11 }
 0xbfe   :  { %479 = vmax.xlane.f32.xlu1 %v478_v49  ;;  %v483_v63 = vshll.u32 %v482_v59, 16  ;;  %v262_v49 = vadd.f32 %v947_v1, %v203_v47 }
 0xbff   :  { %v261_v51 = vadd.f32 %v941_v58, %v202_v48 }
 0xc00   :  { %v321_v53 = vadd.f32 %v964_v50, %v262_v49 }
 0xc01   :  { %v320_v52 = vadd.f32 %v958_v43, %v261_v51 }
 0xc83   :  { %v466_v54 = vpop.xlane.xlu0 %465 }
 0xc84   :  { %v467_v60 = vcvt.f32.s32 %v466_v54 }
 0xc86   :  { %v470_v61 = vadd.s32 %v469_v57, %v467_v60 }
 0xc87   :  { %v480_v62 = vpop.xlane.xlu1 %479 }
 0xc88   :  { %v485_v0 = vsub.s32 128, %v470_v61  ;;  %v481_v2 = vcvt.f32.s32 %v480_v62 }
 0xc8a   :  { %v484_v4 = vadd.s32 %v483_v63, %v481_v2  ;;  %vm487_vm8 = vcmp.eq.s32.totalorder %v878_v7, %v485_v0  ;;  %v1014_v5 = vsel %vm503_vm7, %v485_v0, %v447_v19 }
 0xc8b   :  { %v489_v6 = vsel %vm487_vm8, -1e+30, %v430_v21  ;;  %v499_v10 = vsel %vm487_vm8, %v1009_v3, 0.0 }
 0xc8c   :  { %v486_v13 = vsub.s32 128, %v484_v4  ;;  %508 = vmax.xlane.f32.xlu0 %v489_v6  ;;  %v1017_v14 = vadd.f32 %v499_v10, %v442_v25 }
 0xc8e   :  { %vm488_vm9 = vcmp.eq.s32.totalorder %v878_v7, %v486_v13  ;;  %v1024_v17 = vsel %vm503_vm7, %v486_v13, %v448_v27 }
 0xc8f   :  { %v490_v20 = vsel %vm488_vm9, -1e+30, %v431_v28  ;;  %v500_v23 = vsel %vm488_vm9, %v1019_v16, 0.0 }
 0xc90   :  { %v1027_v19 = vadd.f32 %v500_v23, %v443_v31  ;;  %510 = vmax.xlane.f32.xlu1 %v490_v20 }
 0xd15   :  { %v509_v21 = vpop.xlane.xlu0 %508 }
 0xd16   :  { %vm512_vm13 = vcmp.eq.f32.partialorder %v489_v6, %v509_v21  ;;  %v548_v45 = vsub.f32 %v509_v21, %v883_v9  ;;  %v379_v9 = vadd.f32 %v975_v30, %v320_v52 }
 0xd17   :  { %v1030_v24 = vsel %vm512_vm13, %v881_v8, 0 }
 0xd18   :  { %v517_v25 = vshra.s32 %v1030_v24, 16  ;;  %v550_v41 = vmul.f32 1.442695, %v548_v45  ;;  %v438_v54 = vadd.f32 %v992_v18, %v379_v9  ;;  %v516_v63 = vand.u32 65535, %v1030_v24  ;;  %v576_v45 = vld [vmem:[%s1184_s2 + $0x8] sm:$0xff] }
 0xd19   :  { %v511_v29 = vpop.xlane.xlu1 %510 }
 0xd1a   :  { %vm513_vm15 = vcmp.eq.f32.partialorder %v490_v20, %v511_v29  ;;  %v1033_v32 = vcvt.s32.f32 %v517_v25  ;;  %v549_v39 = vsub.f32 %v511_v29, %v887_v12  ;;  %v380_v12 = vadd.f32 %v981_v37, %v321_v53 }
 0xd1b   :  { %v1036_v27 = vsel %vm513_vm15, %v881_v8, 0  ;;  %v588_v8 = vld [vmem:[%s1184_s2 + $0x68] sm:$0xff]  ;;  %v497_v60 = vadd.f32 %v1009_v3, %v438_v54  ;;  %v518_v2 = vcvt.s32.f32 %v516_v63  ;;  %v151_v29 = vsel %vm150_vm11, 1.0, %v840_v15 }
 0xd1c   :  { %520 = vmax.xlane.f32.xlu0 %v1033_v32  ;;  %v531_v28 = vshra.s32 %v1036_v27, 16  ;;  %749 = vmatprep.subr.mxu1 %v588_v8  ;;  %v552_v46 = vmul.f32 1.442695, %v549_v39  ;;  %v439_v55 = vadd.f32 %v998_v26, %v380_v12  ;;  %v530_v4 = vand.u32 65535, %v1036_v27 }
 0xd1d   :  { %750 = vmatpush3.msra.mxu1 %v588_v8  ;;  %v209_v34 = vsel %vm208_vm12, %v916_v11, %v151_v29  ;;  %vm560_vm11 = vcmp.eq.s32.totalorder %v878_v7, 7 }
 0xd1e   :  { %v1040_v31 = vcvt.s32.f32 %v531_v28  ;;  %751 = vmatprep.subr.mxu1 %v587_v35  ;;  %810 = vpow2.f32 %v552_v46  ;;  %v498_v59 = vadd.f32 %v1019_v16, %v439_v55  ;;  %v532_v13 = vcvt.s32.f32 %v530_v4 }
 0xd1f   :  { %752 = vmatpush3.msra.mxu1 %v587_v35  ;;  %812 = vpow2.f32 %v550_v41  ;;  %v210_v28 = vsel %vm208_vm12, %v927_v22, %v151_v29  ;;  %v268_v35 = vsel %vm267_vm3, %v941_v58, %v209_v34 }
 0xd20   :  { %534 = vmax.xlane.f32.xlu1 %v1040_v31  ;;  %753 = vmatprep.subr.mxu1 %v586_v36  ;;  %v269_v8 = vsel %vm267_vm3, %v947_v1, %v210_v28  ;;  %v327_v1 = vsel %vm326_vm10, %v958_v43, %v268_v35 }
 0xd21   :  { %754 = vmatpush3.msra.mxu1 %v586_v36  ;;  %v328_v22 = vsel %vm326_vm10, %v964_v50, %v269_v8  ;;  %v579_v36 = vld [vmem:[%s1184_s2 + $0x20] sm:$0xff]  ;;  %v386_v50 = vsel %vm385_vm4, %v975_v30, %v327_v1  ;;  %vm668_vm10 = vcmask 261120  }
 0xd22   :  { %755 = vmatprep.subr.mxu1 %v585_v40  ;;  %v387_v11 = vsel %vm385_vm4, %v981_v37, %v328_v22  ;;  %v578_v37 = vld [vmem:[%s1184_s2 + $0x18] sm:$0xff]  ;;  %vm679_vm4 = vcmask 326912  }
 0xd23   :  { %756 = vmatpush3.msra.mxu1 %v585_v40  ;;  %v446_v58 = vsel %vm444_vm14, %v998_v26, %v387_v11  ;;  %v445_v26 = vsel %vm444_vm14, %v992_v18, %v386_v50  ;;  %vm692_vm14 = vcmask 392512  }
 0xd24   :  { %757 = vmatprep.subr.mxu1 %v584_v42  ;;  %v505_v43 = vsel %vm503_vm7, %v1019_v16, %v446_v58  ;;  %v504_v30 = vsel %vm503_vm7, %v1009_v3, %v445_v26  ;;  %v575_v3 = vld [vmem:[%s1184_s2] sm:$0xff] }
 0xd25   :  { %758 = vmatpush3.msra.mxu1 %v584_v42 }
 0xd26   :  { %759 = vmatprep.subr.mxu1 %v583_v38 }
 0xd27   :  { %760 = vmatpush3.msra.mxu1 %v583_v38 }
 0xd28   :  { %761 = vmatprep.subr.mxu1 %v582_v44 }
 0xd29   :  { %762 = vmatpush3.msra.mxu1 %v582_v44  ;;  %v577_v44 = vld [vmem:[%s1184_s2 + $0x10] sm:$0xff] }
 0xd2b   :  { %v1081_v56 = vpop.eup %810 }
 0xd2c   :  { %v1084_v57 = vpop.eup %812  ;;  %v555_v61 = vadd.f32 %v1081_v56, %v498_v59  ;;  %v562_v38 = vsel %vm560_vm11, %v1081_v56, %v505_v43 }
 0xd2d   :  { %v554_v62 = vadd.f32 %v1084_v57, %v497_v60  ;;  %v561_v16 = vsel %vm560_vm11, %v1084_v57, %v504_v30 }
 0xd2e   :  { %814 = vrcp.f32 %v555_v61 }
 0xd2f   :  { %816 = vrcp.f32 %v554_v62 }
 0xd3b   :  { %v815_v23 = vpop.eup %814 }
 0xd3c   :  { %v817_v21 = vpop.eup %816  ;;  %v568_v25 = vmul.f32 %v815_v23, %v555_v61 }
 0xd3d   :  { %v567_v24 = vmul.f32 %v817_v21, %v554_v62 }
 0xd3e   :  { %v570_v27 = vsub.f32 2.0, %v568_v25 }
 0xd40   :  { %v572_v40 = vmul.f32 %v815_v23, %v570_v27 }
 0xd42   :  { %v574_v39 = vmul.f32 %v572_v40, %v562_v38 }
 0xda5   :  { %v1091_v0 = vpop.xlane.xlu0 %520 }
 0xda6   :  { %vm522_vm0 = vcmp.eq.f32.partialorder %v1033_v32, %v1091_v0  ;;  %v581_v32 = vld [vmem:[%s1184_s2 + $0x30] sm:$0xff]  ;;  %v527_v46 = vcvt.f32.s32 %v1091_v0  ;;  %s842_s2 = smov 40  }
 0xda7   :  { %v523_v6 = vsel %vm522_vm0, %v518_v2, -inf  ;;  %763 = vmatprep.subr.mxu1 %v581_v32 }
 0xda8   :  { %524 = vmax.xlane.f32.xlu0 %v523_v6  ;;  %764 = vmatpush3.msra.mxu1 %v581_v32  ;;  %v528_v47 = vshll.u32 %v527_v46, 16 }
 0xda9   :  { %v535_v10 = vpop.xlane.xlu1 %534  ;;  %765 = vmatprep.subr.mxu1 %v580_v33 }
 0xdaa   :  { %vm536_vm1 = vcmp.eq.f32.partialorder %v1040_v31, %v535_v10  ;;  %v569_v31 = vsub.f32 2.0, %v567_v24  ;;  %766 = vmatpush3.msra.mxu1 %v580_v33  ;;  %v541_v48 = vcvt.f32.s32 %v535_v10 }
 0xdab   :  { %v537_v20 = vsel %vm536_vm1, %v532_v13, -inf  ;;  %767 = vmatprep.subr.mxu1 %v579_v36 }
 0xdac   :  { %538 = vmax.xlane.f32.xlu1 %v537_v20  ;;  %v571_v42 = vmul.f32 %v817_v21, %v569_v31  ;;  %768 = vmatpush3.msra.mxu1 %v579_v36  ;;  %v542_v52 = vshll.u32 %v541_v48, 16 }
 0xdad   :  { %769 = vmatprep.subr.mxu1 %v578_v37 }
 0xdae   :  { %770 = vmatpush3.msra.mxu1 %v578_v37  ;;  %v573_v18 = vmul.f32 %v571_v42, %v561_v16 }
 0xdaf   :  { %771 = vmatprep.subr.mxu1 %v577_v44 }
 0xdb0   :  { %772 = vmatpush3.msra.mxu1 %v577_v44 }
 0xdb1   :  { %773 = vmatprep.subr.mxu1 %v576_v45 }
 0xdb2   :  { %774 = vmatpush3.msra.mxu1 %v576_v45 }
 0xdb3   :  { %775 = vmatprep.subr.mxu1 %v575_v3 }
 0xdb4   :  { %776 = vmatpush3.msra.mxu1 %v575_v3 }
 0xdbd   :  { %675 = vrot.lane.b32.xlu1 %v574_v39, %s841_s21 }
 0xdbe   :  { %673 = vrot.lane.b32.xlu0 %v573_v18, %s841_s21 }
 0xe31   :  { %v525_v41 = vpop.xlane.xlu0 %524 }
 0xe32   :  { %v526_v49 = vcvt.f32.s32 %v525_v41 }
 0xe34   :  { %v529_v51 = vadd.s32 %v528_v47, %v526_v49 }
 0xe35   :  { %v539_v53 = vpop.xlane.xlu1 %538 }
 0xe36   :  { %v544_v12 = vsub.s32 128, %v529_v51  ;;  %v540_v9 = vcvt.f32.s32 %v539_v53 }
 0xe38   :  { %v543_v55 = vadd.s32 %v542_v52, %v540_v9  ;;  %v563_v54 = vsel %vm560_vm11, %v544_v12, %v1014_v5  ;;  %vm546_vm12 = vcmp.eq.s32.totalorder %v878_v7, %v544_v12 }
 0xe39   :  { %v682_v59 = vcvt.s32.f32 %v563_v54  ;;  %v556_v60 = vsel %vm546_vm12, %v1084_v57, 0.0  ;;  %v676_v57 = vpop.permute.xlu1 %675 }
 0xe3a   :  { %v545_v61 = vsub.s32 128, %v543_v55  ;;  %v558_v62 = vadd.f32 %v556_v60, %v1017_v14 }
 0xe3b   :  { %686 = vrot.lane.b32.xlu1 %v682_v59, %s842_s2 }
 0xe3c   :  { %vm547_vm3 = vcmp.eq.s32.totalorder %v878_v7, %v545_v61  ;;  %777 = vmatprep.mubr.f32.mxu1 %v558_v62  ;;  %v564_v63 = vsel %vm560_vm11, %v545_v61, %v1024_v17  ;;  %v674_v17 = vpop.permute.xlu0 %673 }
 0xe3d   :  { %v683_v0 = vcvt.s32.f32 %v564_v63  ;;  %v557_v5 = vsel %vm547_vm3, %v1081_v56, 0.0 }
 0xe3e   :  { %v559_v2 = vadd.f32 %v557_v5, %v1027_v19 }
 0xe3f   :  { %688 = vrot.lane.b32.xlu1 %v683_v0, %s842_s2 }
 0xe40   :  { %778 = vmatmul.mubr.f32.vlgmr.msra.gmra.mxu1 %v559_v2 }
 0xead   :  { %v687_v4 = vpop.permute.xlu1 %686 }
 0xeb1   :  { %v689_v7 = vpop.permute.xlu1 %688 }
 0xf00   :  { %v779_v6 = vpop.f32.mrf.mxu1 }
 0xf01   :  { %v667_v14 = vmul.f32 %v779_v6, %v572_v40 }
 0xf02   :  { %v657_v10 = vpop.f32.mrf.mxu1 }
 0xf03   :  { %670 = vst.msk [vmem:[#allocation2 + $0x8] sm:$0xff] %vm668_vm10, %v667_v14  ;;  %v666_v13 = vmul.f32 %v657_v10, %v571_v42 }
 0xf04   :  { %681 = vst.msk [vmem:[#allocation2 + $0x8] sm:$0xff] %vm679_vm4, %v676_v57 }
 0xf05   :  { %694 = vst.msk [vmem:[#allocation2 + $0x8] sm:$0xff] %vm692_vm14, %v689_v7 }
 0xf06   :  { %669 = vst.msk [vmem:[#allocation2] sm:$0xff] %vm668_vm10, %v666_v13 }
 0xf07   :  { %680 = vst.msk [vmem:[#allocation2] sm:$0xff] %vm679_vm4, %v674_v17 }
 0xf08   :  { %697 = vst.msk [vmem:[#allocation2 + $0x8] sm:$0xff] %vm695_vm2, %v840_v15 }
 0xf09   :  { %693 = vst.msk [vmem:[#allocation2] sm:$0xff] %vm692_vm14, %v687_v4 }
 0xf0a   :  { %696 = vst.msk [vmem:[#allocation2] sm:$0xff] %vm695_vm2, %v840_v15 }
 0xf0b   :  { %829 = shalt.err (!%p826_p4)
}
 0xf0c   :  { %s844_s25 = smov 128   ;;  %s845_s26 = smov 8  }
 0xf0d   :  { %709 = dma.vmem_to_hbm [thread:$0]  %s704_s23, 256, %s1185_s3, [#allocation3], %s844_s25, %s844_s25, %s845_s26  }
 0xf0e   :  { %838 = dma.done.wait [#allocation3], 256  }
 0xf0f   :  { %839 = vsyncadd [#allocation3], 4294967040 }
 0xf10   :  { %713 = vsyncpa [#allocation3], 1 }

</bundles_post_ra>
